<compile_context>
chip_gen: v5e
topology: v5e:2x2
jax: 0.10.0
libtpu: 0.0.40
codegen_flags: <defaults>
</compile_context>

<pallas_src>
import functools

import jax
import jax.numpy as jnp
from jax.experimental import pallas as pl
from jax.experimental.pallas import tpu as pltpu


# ----------------------------------------------------------------------------
# helpers
# ----------------------------------------------------------------------------
def _pad128(c):
    return ((c + 127) // 128) * 128


_TAPS = tuple((dh, dw) for dh in (-1, 0, 1) for dw in (-1, 0, 1))


@functools.lru_cache(maxsize=None)
def _roll_is_numpy_like():
    """One-time probe: does pltpu.roll follow np.roll semantics (out[p]=x[p-shift])?"""
    def probe(x_ref, o_ref):
        o_ref[...] = pltpu.roll(x_ref[...], 1, 0)

    x = jnp.tile(jnp.arange(8, dtype=jnp.float32)[:, None], (1, 128))
    out = pl.pallas_call(
        probe,
        out_shape=jax.ShapeDtypeStruct((8, 128), jnp.float32),
        in_specs=[pl.BlockSpec(memory_space=pltpu.MemorySpace.VMEM)],
        out_specs=pl.BlockSpec(memory_space=pltpu.MemorySpace.VMEM),
    )(x)
    return bool(out[0, 0] == 7.0)


@functools.lru_cache(maxsize=None)
def _pool_matrix(h, w, batch):
    """Block-diagonal (batch*h*w/4, batch*h*w) 2x2 average-pool matrix (bf16)."""
    hw, hwo = h * w, (h // 2) * (w // 2)
    src = jnp.arange(hw)
    dst = (src // w // 2) * (w // 2) + (src % w) // 2
    per_img = (dst[None, :] == jnp.arange(hwo)[:, None]).astype(jnp.float32) * 0.25
    return jnp.kron(jnp.eye(batch, dtype=jnp.float32), per_img).astype(jnp.bfloat16)


def _resident_spec(arr):
    """Full-array BlockSpec with a constant index_map -> fetched once, VMEM-resident."""
    zeros = (0,) * arr.ndim
    # TODO(synk): pipeline_mode=pl.Buffered(1) would drop the unused second pipeline
    #             buffer of these resident operands; default kept for lowering safety
    #             (VMEM headroom is ample at these sizes).
    return pl.BlockSpec(arr.shape, lambda n, _z=zeros: _z)


# ----------------------------------------------------------------------------
# fused forward kernel (4 residual blocks + heads)
# ----------------------------------------------------------------------------
def _tap_masks(batch, h, w):
    """Boundary masks for the 8 non-centre taps, hoisted once per block and shared
    by conv1 and conv2.  Positions are taken modulo h*w so image seams inside a
    batched chunk are zeroed exactly like real borders."""
    m = batch * h * w
    lin = jax.lax.broadcasted_iota(jnp.int32, (m, 1), 0)
    s = lin % (h * w)
    row = s // w
    col = s % w
    masks = {}
    for dh, dw in _TAPS:
        if dh == 0 and dw == 0:
            continue
        masks[(dh, dw)] = ((row + dh >= 0) & (row + dh < h)
                          & (col + dw >= 0) & (col + dw < w))
    return masks


def _patch(src_f32, masks, w, roll_sign):
    """(M, C) f32 -> (M, 9*C) bf16 merged-tap im2col patch ('same', zero padded).

    Spatial shifts are in-register pltpu.roll (XLU); boundary/seam taps are zeroed
    with the hoisted masks; the 9 taps are concatenated at 128-aligned lane offsets
    so ONE large-K MXU matmul replaces 9 small ones plus 8 VPU adds."""
    m = src_f32.shape[0]
    taps = []
    for dh, dw in _TAPS:
        shift = dh * w + dw
        if shift == 0:
            taps.append(src_f32.astype(jnp.bfloat16))
        else:
            rolled = pltpu.roll(src_f32, (roll_sign * shift) % m, 0)
            taps.append(jnp.where(masks[(dh, dw)], rolled, 0.0).astype(jnp.bfloat16))
    # TODO(synk): roll/mask directly in bf16 (v6e/v7x win) once packed-bf16 sublane
    #             rolls are verified on the target toolchain; f32 rolls kept for safety.
    return jnp.concatenate(taps, axis=-1)


def _fused_kernel(*refs, batch, H, W, roll_sign):
    x_ref = refs[0]
    blocks = [refs[1 + 5 * i: 6 + 5 * i] for i in range(4)]
    head_w_ref, head_b_ref = refs[-3], refs[-2]
    out_ref = refs[-1]

    # Widen the (M0, 8)-channel input to 128 lanes with a tiny identity-embed
    # matmul (the HBM input itself stays un-padded -> no inflated input DMA).
    cs = x_ref.shape[-1]
    eye = (jax.lax.broadcasted_iota(jnp.int32, (cs, 128), 0)
           == jax.lax.broadcasted_iota(jnp.int32, (cs, 128), 1)).astype(jnp.bfloat16)
    x_in = jnp.dot(x_ref[...], eye, preferred_element_type=jnp.float32)   # (M0, 128)

    h, w = H, W
    pooled = None
    for bi, (w1_ref, b1_ref, w2sc_ref, b2sc_ref, pool_ref) in enumerate(blocks):
        masks = _tap_masks(batch, h, w)                 # hoisted, shared by both convs

        # residual path: (ReLU) -> conv1 -> ReLU -> conv2
        src1 = jnp.maximum(x_in, 0.0) if bi > 0 else x_in   # Block vs OptimizedBlock
        p1 = _patch(src1, masks, w, roll_sign)
        h1 = jnp.maximum(
            jnp.dot(p1, w1_ref[...], preferred_element_type=jnp.float32)
            + b1_ref[...], 0.0)

        # conv2 + 1x1 shortcut share ONE matmul (K = 9*Chid_pad + Cin_pad); the
        # residual add therefore happens inside the MXU accumulator.
        p2sc = jnp.concatenate(
            [_patch(h1, masks, w, roll_sign), x_in.astype(jnp.bfloat16)], axis=-1)
        res = (jnp.dot(p2sc, w2sc_ref[...], preferred_element_type=jnp.float32)
               + b2sc_ref[...])

        # 2x2 average pool as a small lane-dense matmul (block-diagonal over the
        # images of this grid step).  A 1x1 conv commutes with avg-pool, so pooling
        # once after the residual add matches both Block and OptimizedBlock.
        pooled = jnp.dot(pool_ref[...], res.astype(jnp.bfloat16),
                         preferred_element_type=jnp.float32)
        x_in = pooled
        h //= 2
        w //= 2

    # fused tail: ReLU + per-image spatial sum (selection matmul, no sub-8-row
    # reshape) + concatenated [dis | aux | p | q] linears -> (batch, 128) logits.
    hw_f = h * w
    mf = batch * hw_f
    relu4 = jnp.maximum(pooled, 0.0)
    sel = (jax.lax.broadcasted_iota(jnp.int32, (batch, mf), 1) // hw_f
           == jax.lax.broadcasted_iota(jnp.int32, (batch, mf), 0)).astype(jnp.float32)
    feat = jnp.dot(sel, relu4, preferred_element_type=jnp.float32)        # (batch, Cf)
    logits = (jnp.dot(feat, head_w_ref[...], preferred_element_type=jnp.float32)
              + head_b_ref[...])
    out_ref[:, 0, :] = logits


def fused_forward(params, x_flat, n_pad, batch, H, W):
    """x_flat: (n_pad*H*W, 8) bf16 -> (n_pad, 1, HP) f32 concatenated head logits."""
    roll_sign = -1 if _roll_is_numpy_like() else 1
    hw = H * W
    hp = params["head_b"].shape[-1]

    args = [x_flat]
    in_specs = [pl.BlockSpec((batch * hw, x_flat.shape[-1]), lambda n: (n, 0))]
    h, w = H, W
    for bi in range(1, 5):
        p = params[f"block{bi}"]
        for a in (p["w1"], p["b1"], p["w2sc"], p["b2sc"], _pool_matrix(h, w, batch)):
            args.append(a)
            in_specs.append(_resident_spec(a))
        h //= 2
        w //= 2
    for a in (params["head_w"], params["head_b"]):
        args.append(a)
        in_specs.append(_resident_spec(a))

    kernel = functools.partial(_fused_kernel, batch=batch, H=H, W=W,
                               roll_sign=roll_sign)
    return pl.pallas_call(
        kernel,
        grid=(n_pad // batch,),
        in_specs=in_specs,
        out_specs=pl.BlockSpec((batch, 1, hp), lambda n: (n, 0, 0)),
        out_shape=jax.ShapeDtypeStruct((n_pad, 1, hp), jnp.float32),
        compiler_params=pltpu.CompilerParams(
            dimension_semantics=("parallel",),      # batch chunks -> both TCs on v7x
            vmem_limit_bytes=48 * 1024 * 1024,      # fits v7x's 64 MiB physical VMEM
        ),
    )(*args)


# ----------------------------------------------------------------------------
# Full forward (matches _netD_Res32.forward with default 'ce' MI config)
# ----------------------------------------------------------------------------
def forward(params, x_nchw, y=None, distribution="", num_classes=10):
    N, C, H, W = x_nchw.shape
    assert H % 16 == 0 and W % 16 == 0, "4 downsampling blocks need H, W % 16 == 0"
    cs = 8
    assert C <= cs

    # NCHW -> flattened NHWC; channels padded only 3->8 in HBM (the 8->128 lane
    # widening happens inside the kernel).
    x = jnp.transpose(x_nchw, (0, 2, 3, 1)).astype(jnp.bfloat16)
    x = jnp.pad(x, ((0, 0), (0, 0), (0, 0), (0, cs - C)))

    # Images per grid step: raise matmul M / amortize per-step overhead while keeping
    # the grid length >= 2 (both v7x TensorCores busy) and the VMEM footprint modest.
    b_target = max(1, 1024 // (H * W))
    batch = max(1, min(b_target, N // 2)) if N >= 2 else 1
    n_pad = ((N + batch - 1) // batch) * batch
    if n_pad != N:
        x = jnp.pad(x, ((0, n_pad - N), (0, 0), (0, 0), (0, 0)))
    x_flat = x.reshape(n_pad * H * W, cs)

    logits = fused_forward(params, x_flat, n_pad, batch, H, W)[:N, 0, :]

    nc = num_classes
    if y is None:
        realfake = logits[:, 0]                       # linear_dis(h).squeeze(1)
        classes = logits[:, 1:1 + nc]                 # linear_aux(h)
        return realfake, classes

    # mi_type_{p,q} == 'ce':  t = -cross_entropy(linear(h), y).view(-1, 1)
    if distribution == "P":
        lg = logits[:, 1 + nc:1 + 2 * nc]
    else:
        lg = logits[:, 1 + 2 * nc:1 + 3 * nc]
    lse = jax.nn.logsumexp(lg, axis=1)
    picked = jnp.take_along_axis(lg, y[:, None], axis=1)[:, 0]
    return (-(lse - picked))[:, None]


# ----------------------------------------------------------------------------
# Deterministic synthetic parameter init (pre-padded, merged-K layouts)
# ----------------------------------------------------------------------------
def init_params(key, nf=8, nc=10, in_ch=3):
    keys = iter(jax.random.split(key, 16))

    def conv3_taps(cin, cout):
        # torch Conv2d (O, I, 3, 3) -> w.permute(2, 3, 1, 0).reshape(9, I, O), padded.
        w = 0.02 * jax.random.normal(next(keys), (9, cin, cout), jnp.float32)
        w = jnp.pad(w, ((0, 0), (0, _pad128(cin) - cin), (0, _pad128(cout) - cout)))
        return w.reshape(9 * _pad128(cin), _pad128(cout)).astype(jnp.bfloat16)

    def conv1(cin, cout):
        w = 0.02 * jax.random.normal(next(keys), (cin, cout), jnp.float32)
        w = jnp.pad(w, ((0, _pad128(cin) - cin), (0, _pad128(cout) - cout)))
        return w.astype(jnp.bfloat16)

    def block(cin, chid, cout):
        w1 = conv3_taps(cin, chid)
        b1 = jnp.zeros((1, _pad128(chid)), jnp.float32)
        # conv2 + 1x1 shortcut merged into one (9*Chid_pad + Cin_pad, Cout_pad) matmul;
        # their (zero) biases are pre-summed.
        w2sc = jnp.concatenate([conv3_taps(chid, cout), conv1(cin, cout)], axis=0)
        b2sc = jnp.zeros((1, _pad128(cout)), jnp.float32)
        return dict(w1=w1, b1=b1, w2sc=w2sc, b2sc=b2sc)

    params = {
        "block1": block(in_ch, nf, nf),               # OptimizedBlock(3, nf)
        "block2": block(nf, nf, 2 * nf),              # Block(nf, 2nf, downsample)
        "block3": block(2 * nf, 2 * nf, 4 * nf),
        "block4": block(4 * nf, 4 * nf, 8 * nf),
    }
    # Concatenated heads: columns = [dis(1) | aux(nc) | p(nc) | q(nc)], padded to 128.
    n_head = 1 + 3 * nc
    hp = _pad128(n_head)
    wh = 0.02 * jax.random.normal(next(keys), (8 * nf, n_head), jnp.float32)
    wh = jnp.pad(wh, ((0, _pad128(8 * nf) - 8 * nf), (0, hp - n_head)))
    params["head_w"] = wh                             # kept f32 for head precision
    params["head_b"] = jnp.zeros((1, hp), jnp.float32)
    return params


if __name__ == "__main__":
    key = jax.random.PRNGKey(0)
    kx, kp, ky = jax.random.split(key, 3)
    nf, nc = 8, 10

    # small NCHW input (torch convention): batch=2, C=3, H=W=16
    x = jax.random.normal(kx, (2, 3, 16, 16), jnp.float32)
    y = jax.random.randint(ky, (2,), 0, nc)
    params = init_params(kp, nf=nf, nc=nc)

    realfake, classes = forward(params, x, num_classes=nc)            # y is None branch
    t_p = forward(params, x, y=y, distribution="P", num_classes=nc)   # 'ce' P branch
    t_q = forward(params, x, y=y, distribution="Q", num_classes=nc)   # 'ce' Q branch

    jax.block_until_ready((realfake, classes, t_p, t_q))
    assert realfake.shape == (2,)
    assert classes.shape == (2, nc)
    assert t_p.shape == (2, 1)
    assert t_q.shape == (2, 1)
    print("KERNEL_OK")
</pallas_src>

<mosaic_0001>
module attributes {stable_mosaic.version = 11 : i64} {
  func.func @probe(%arg0: memref<8x128xf32, #tpu.memory_space<vmem>>, %arg1: memref<8x128xf32, #tpu.memory_space<vmem>>) attributes {dimension_semantics = [], scalar_prefetch = 0 : i64, scratch_operands = 0 : i64, tpu.core_type = #tpu.core_type<tc>} {
    %c0 = arith.constant 0 : index
    %c0_0 = arith.constant 0 : index
    %0 = vector.load %arg0[%c0, %c0_0] : memref<8x128xf32, #tpu.memory_space<vmem>>, vector<8x128xf32>
    %c1_i32 = arith.constant 1 : i32
    %1 = tpu.dynamic_rotate %0 by %c1_i32 dim 0 : vector<8x128xf32>, i32 -> vector<8x128xf32>
    %c0_1 = arith.constant 0 : index
    %c0_2 = arith.constant 0 : index
    %2 = vector.load %arg1[%c0_1, %c0_2] : memref<8x128xf32, #tpu.memory_space<vmem>>, vector<8x128xf32>
    tpu.vector_store %arg1[%c0_1, %c0_2], %1 {strides = array<i32>} : memref<8x128xf32, #tpu.memory_space<vmem>>, vector<8x128xf32>,
    return
  }
}

</mosaic_0001>

<bundles_post_ra>
// kernel: tpu_custom_call.1
= control target key start
LH: loop header
LB: loop body
LE: loop exit
PB: predicated region body
PF: predicated region fallthrough
CT: control target
= control target key end

     0   :  { %6 = vsyncpa [#allocation3], 0  ;;  %s115_s0 = inlined_call_operand.hbm [shape: f32[8,128], index: 0, kind: input, shape index: {}]   ;;  %s116_s1 = inlined_call_operand.hbm [shape: f32[8,128], index: 1, kind: output, shape index: {}]  }
   0x1   :  { %7 = vsyncpa [#allocation4], 0  ;;  %s13_s8 = sshll.u32 %s115_s0, 4  ;;  %s97_s9 = smov [#allocation2]   ;;  %s14_s8 = int_to_ptr.hbm [resolvable:$true] %s13_s8 }
   0x2   :  { %s15_s10 = sshll.u32 %s97_s9, 4  ;;  %s16_s10 = int_to_ptr.vmem [resolvable:$true] %s15_s10 }
   0x3   :  { %18 = dma.hbm_to_vmem [thread:$0]  %s14_s8, 128, %s16_s10, [#allocation3]  }
   0x4   :  { %93 = dma.done.wait [#allocation3], 128  }
   0x5   :  { %94 = vsyncadd [#allocation3], 4294967168  ;;  %s98_s11 = smov [#allocation5]   ;;  %s33_s15 = sshll.u32 %s116_s1, 4  ;;  %v23_v0 = vld [vmem:[#allocation2] sm:$0xff]  ;;  %s34_s15 = int_to_ptr.hbm [resolvable:$true] %s33_s15 }
   0x6   :  { %s31_s12 = sshll.u32 %s98_s11, 4  ;;  %v24_v1 = vrot.slane %v23_v0, 7  ;;  %s32_s12 = int_to_ptr.vmem [resolvable:$true] %s31_s12 }
   0x8   :  { %25 = vst [vmem:[#allocation5] sm:$0xff] %v24_v1 }
   0x9   :  { %36 = dma.vmem_to_hbm [thread:$0]  %s32_s12, 128, %s34_s15, [#allocation4]  }
   0xa   :  { %95 = dma.done.wait [#allocation4], 128  }
   0xb   :  { %96 = vsyncadd [#allocation4], 4294967168 }
   0xc   :  { %41 = vsyncpa [#allocation3], 1 }
   0xd   :  { %42 = vsyncpa [#allocation4], 1 }

</bundles_post_ra>
